<compile_context>
chip_gen: v7x
topology: tpu7x:2x2x1
jax: 0.10.0
libtpu: 0.0.40
codegen_flags: <defaults>
</compile_context>

<pallas_src>
import functools

import jax
import jax.numpy as jnp
from jax.experimental import pallas as pl
from jax.experimental.pallas import tpu as pltpu


LEAKY_SLOPE = 0.2
IN_EPS = 1e-5
VMEM_LIMIT_BYTES = 48 * 1024 * 1024    # < 64 MiB (v7x physical), << 128 MiB (v5e/v6e)
X_BLOCK_BYTES_BUDGET = 8 * 1024 * 1024  # double-buffered bf16 patch block budget


def _leaky_relu(y, slope):
    return jnp.where(y > 0, y, slope * y)


def _round_up(x, m):
    return ((x + m - 1) // m) * m


# ----------------------------------------------------------------------------
# Kernel A: conv (+ bias) [+ LeakyReLU] [+ Sigmoid]  -- layers WITHOUT norm
#   x_ref: (1, CK, HWt) bf16 patches    w_ref: (C_out, CK) bf16
#   b_ref: (C_out, 1)   f32             o_ref: (1, C_out, HWt) f32
# ----------------------------------------------------------------------------
def conv_bias_kernel(x_ref, w_ref, b_ref, o_ref, *, do_act, do_sigmoid):
    y = jnp.dot(w_ref[...], x_ref[0], preferred_element_type=jnp.float32)
    y = y + b_ref[...]                      # (C_out, 1) broadcast over lanes
    if do_act:
        y = _leaky_relu(y, LEAKY_SLOPE)
    if do_sigmoid:
        y = jax.nn.sigmoid(y)
    o_ref[0] = y.astype(o_ref.dtype)


# ----------------------------------------------------------------------------
# Kernel B: conv + InstanceNorm2d(affine=False) + LeakyReLU  -- norm layers
#   Output block is the full (1, C_out, HW_pad) per sample (resident in VMEM
#   across the HW grid axis); per-channel sum / sum-of-squares accumulate in
#   scratch and the last HW step normalizes + activates in place (one-pass
#   variance).  Padded lanes are zero so they do not perturb the statistics.
#   The conv bias is intentionally omitted (mean subtraction cancels it).
# ----------------------------------------------------------------------------
def conv_norm_act_kernel(x_ref, w_ref, o_ref, sum_ref, sq_ref, *,
                         hw_tile, hw_pad, hw_valid):
    hw_idx = pl.program_id(1)
    n_hw = pl.num_programs(1)

    @pl.when(hw_idx == 0)
    def _init():
        sum_ref[...] = jnp.zeros_like(sum_ref)
        sq_ref[...] = jnp.zeros_like(sq_ref)

    y = jnp.dot(w_ref[...], x_ref[0], preferred_element_type=jnp.float32)

    sum_ref[...] += jnp.sum(y, axis=-1, keepdims=True)       # (C_out, 1)
    sq_ref[...] += jnp.sum(y * y, axis=-1, keepdims=True)    # (C_out, 1)

    if hw_tile == hw_pad:            # single tile: plain full-block store
        o_ref[0] = y
    else:                            # hw_tile is a multiple of 128 by design
        start = pl.multiple_of(hw_idx * hw_tile, 128)
        o_ref[0, :, pl.ds(start, hw_tile)] = y

    @pl.when(hw_idx == n_hw - 1)
    def _finalize():
        inv_hw = 1.0 / float(hw_valid)     # statistics over the VALID lanes only
        mean = sum_ref[...] * inv_hw                          # (C_out, 1)
        var = jnp.maximum(sq_ref[...] * inv_hw - mean * mean, 0.0)
        scale = jax.lax.rsqrt(var + IN_EPS)
        yn = (o_ref[0] - mean) * scale                        # (C_out, HW_pad)
        o_ref[0] = _leaky_relu(yn, LEAKY_SLOPE)


# ----------------------------------------------------------------------------
# Glue: lane-dense im2col (trace-time slicing; CK ordered (C, kh, kw) so it
# matches w.reshape(C_out, C_in*k*k)).
# ----------------------------------------------------------------------------
def _im2col_lane_dense(x, k, stride, pad):
    N, C, H, W = x.shape
    xp = jnp.pad(x, ((0, 0), (0, 0), (pad, pad), (pad, pad)))
    H_out = (H + 2 * pad - k) // stride + 1
    W_out = (W + 2 * pad - k) // stride + 1
    cols = []
    for kh in range(k):
        for kw in range(k):
            cols.append(xp[:, :,
                           kh: kh + stride * (H_out - 1) + 1: stride,
                           kw: kw + stride * (W_out - 1) + 1: stride])
    p = jnp.stack(cols, axis=2)                  # [N, C, k*k, H_out, W_out]
    p = p.reshape(N, C * k * k, H_out * W_out)   # CK on sublanes, HW on lanes
    return p, H_out, W_out


def _choose_hw_tile(hw_pad, ck, target_lanes=2048,
                    x_bytes_budget=X_BLOCK_BYTES_BUDGET):
    """Largest multiple-of-128 divisor of hw_pad that fits target & VMEM budget."""
    assert hw_pad % 128 == 0
    # Cap the target so the double-buffered bf16 patch block stays in budget.
    max_by_vmem = max(128, (x_bytes_budget // (2 * 2 * max(ck, 1))) // 128 * 128)
    target = min(target_lanes, max_by_vmem)
    if hw_pad <= target:
        return hw_pad
    t = max(128, (target // 128) * 128)
    while hw_pad % t != 0:
        t -= 128
    return t


def conv_block(x, w, b, *, stride, do_norm, do_act, do_sigmoid,
               hw_tile_lanes=2048):
    """One block: Conv2d(k=4, p=1) [+ InstanceNorm2d] [+ LeakyReLU] [+ Sigmoid]."""
    N, C_in, H, W = x.shape
    C_out, _, k, _ = w.shape
    if do_norm:
        assert do_act and not do_sigmoid

    # bf16 before im2col: the materialized patch slab costs half the HBM bytes.
    x_bf = x.astype(jnp.bfloat16)
    patches, H_out, W_out = _im2col_lane_dense(x_bf, k=k, stride=stride, pad=1)
    HW = H_out * W_out
    CK = C_in * k * k

    # Pad lanes to 128 / sublanes to 8 => unmasked vst, clean (8,128) tiling.
    HW_pad = _round_up(HW, 128)
    C_out_pad = _round_up(C_out, 8)
    if HW_pad != HW:
        patches = jnp.pad(patches, ((0, 0), (0, 0), (0, HW_pad - HW)))

    w_mat = w.reshape(C_out, CK).astype(jnp.bfloat16)
    if C_out_pad != C_out:
        w_mat = jnp.pad(w_mat, ((0, C_out_pad - C_out), (0, 0)))

    hw_tile = _choose_hw_tile(HW_pad, CK, hw_tile_lanes)
    n_hw = HW_pad // hw_tile
    out_shape = jax.ShapeDtypeStruct((N, C_out_pad, HW_pad), jnp.float32)

    x_spec = pl.BlockSpec((1, CK, hw_tile), lambda n, hw: (n, 0, hw))
    w_spec = pl.BlockSpec((C_out_pad, CK), lambda n, hw: (0, 0))

    if do_norm:
        kernel = functools.partial(conv_norm_act_kernel,
                                   hw_tile=hw_tile, hw_pad=HW_pad, hw_valid=HW)
        grid_spec = pltpu.PrefetchScalarGridSpec(
            num_scalar_prefetch=0,
            grid=(N, n_hw),
            in_specs=[x_spec, w_spec],
            out_specs=pl.BlockSpec((1, C_out_pad, HW_pad), lambda n, hw: (n, 0, 0)),
            scratch_shapes=[pltpu.VMEM((C_out_pad, 1), jnp.float32),
                            pltpu.VMEM((C_out_pad, 1), jnp.float32)])
        dim_sem = ("parallel", "arbitrary")
        args = (patches, w_mat)
    else:
        b_pad = b.astype(jnp.float32)
        if C_out_pad != C_out:
            b_pad = jnp.pad(b_pad, (0, C_out_pad - C_out))
        b_pad = b_pad.reshape(C_out_pad, 1)
        kernel = functools.partial(conv_bias_kernel,
                                   do_act=do_act, do_sigmoid=do_sigmoid)
        grid_spec = pltpu.PrefetchScalarGridSpec(
            num_scalar_prefetch=0,
            grid=(N, n_hw),
            in_specs=[x_spec, w_spec,
                      pl.BlockSpec((C_out_pad, 1), lambda n, hw: (0, 0))],
            out_specs=pl.BlockSpec((1, C_out_pad, hw_tile), lambda n, hw: (n, 0, hw)),
            scratch_shapes=[])
        dim_sem = ("parallel", "parallel")
        args = (patches, w_mat, b_pad)

    out = pl.pallas_call(
        kernel,
        out_shape=out_shape,
        grid_spec=grid_spec,
        compiler_params=pltpu.CompilerParams(
            dimension_semantics=dim_sem,
            vmem_limit_bytes=VMEM_LIMIT_BYTES),
    )(*args)

    # Drop the padded channels / lanes; (N, C_out, HW) is already channel-major
    # so it reshapes straight to NCHW with no transpose.
    out = out[:, :C_out, :HW]
    return out.reshape(N, C_out, H_out, W_out)


# ----------------------------------------------------------------------------
# PatchDiscriminator forward (returns result[1:], i.e. the 5 block outputs)
# ----------------------------------------------------------------------------
def patch_discriminator_forward(x, params, block_cfg):
    results = []
    h = x
    for (w, b), cfg in zip(params, block_cfg):
        h = conv_block(h, w, b,
                       stride=cfg["stride"],
                       do_norm=cfg["norm"],
                       do_act=cfg["act"],
                       do_sigmoid=cfg["sigmoid"])
        results.append(h)
    return results


def init_params(key, block_channels):
    """Deterministic init (normal * 0.02, small random bias)."""
    params = []
    for i, (c_in, c_out) in enumerate(block_channels):
        kw_, kb_ = jax.random.split(jax.random.fold_in(key, i))
        w = 0.02 * jax.random.normal(kw_, (c_out, c_in, 4, 4), dtype=jnp.float32)
        b = 0.02 * jax.random.normal(kb_, (c_out,), dtype=jnp.float32)
        params.append((w, b))
    return params


# ----------------------------------------------------------------------------
# Pure-JAX single-block reference (same bf16-rounded inputs as the kernel)
# ----------------------------------------------------------------------------
def _ref_block(x, w, b, *, stride, do_norm, do_act, do_sigmoid):
    xb = x.astype(jnp.bfloat16).astype(jnp.float32)
    wb = w.astype(jnp.bfloat16).astype(jnp.float32)
    y = jax.lax.conv_general_dilated(
        xb, wb, window_strides=(stride, stride), padding=((1, 1), (1, 1)),
        dimension_numbers=("NCHW", "OIHW", "NCHW"),
        precision=jax.lax.Precision.HIGHEST)
    if do_norm:
        # Pre-norm bias is a mathematical no-op (mean subtraction), so skipped.
        mean = jnp.mean(y, axis=(2, 3), keepdims=True)
        var = jnp.mean(jnp.square(y - mean), axis=(2, 3), keepdims=True)
        y = (y - mean) * jax.lax.rsqrt(var + IN_EPS)
    else:
        y = y + b.reshape(1, -1, 1, 1)
    if do_act:
        y = _leaky_relu(y, LEAKY_SLOPE)
    if do_sigmoid:
        y = jax.nn.sigmoid(y)
    return y


if __name__ == "__main__":
    # opt: input_ch=3, output_ch=1 -> input_channel=4; n_df=8; HD=True
    N, input_channel, n_df, H, W = 2, 4, 8, 256, 256
    HD = True

    block_channels = [
        (input_channel, n_df),
        (n_df, 2 * n_df),
        (2 * n_df, 4 * n_df),
        (4 * n_df, 8 * n_df),
        (8 * n_df, 1),
    ]
    block_cfg = [
        {"stride": 2, "norm": False, "act": True,  "sigmoid": False},
        {"stride": 2, "norm": True,  "act": True,  "sigmoid": False},
        {"stride": 2, "norm": True,  "act": True,  "sigmoid": False},
        {"stride": 1, "norm": True,  "act": True,  "sigmoid": False},
        {"stride": 1, "norm": False, "act": False, "sigmoid": not HD},
    ]

    key = jax.random.PRNGKey(0)
    kx, kp = jax.random.split(key)
    x = jax.random.normal(kx, (N, input_channel, H, W), dtype=jnp.float32)
    params = init_params(kp, block_channels)

    outs = patch_discriminator_forward(x, params, block_cfg)
    outs = [jax.block_until_ready(o) for o in outs]

    # Shape check: 256 -> 128 -> 64 -> 32 -> 31 -> 30 (k=4, p=1, strides 2,2,2,1,1)
    expected = [(N, n_df, 128, 128), (N, 2 * n_df, 64, 64), (N, 4 * n_df, 32, 32),
                (N, 8 * n_df, 31, 31), (N, 1, 30, 30)]
    for o, e in zip(outs, expected):
        assert o.shape == e, (o.shape, e)

    # Per-layer numerical check: feed the kernel chain's input into a pure-JAX
    # reference of the same layer; only accumulation order / one-pass variance
    # differ, so tolerances are loose relative to any real bug.
    h = x
    for (w, b), cfg, o in zip(params, block_cfg, outs):
        ref = _ref_block(h, w, b, stride=cfg["stride"], do_norm=cfg["norm"],
                         do_act=cfg["act"], do_sigmoid=cfg["sigmoid"])
        max_err = float(jnp.max(jnp.abs(ref - o)))
        assert bool(jnp.allclose(ref, o, atol=1e-2, rtol=1e-2)), (o.shape, max_err)
        h = o

    print("KERNEL_OK")
</pallas_src>

<mosaic_0001>
module attributes {stable_mosaic.version = 11 : i64} {
  func.func @conv_bias_kernel(%arg0: i32, %arg1: i32, %arg2: memref<1x64x2048xbf16, #tpu.memory_space<vmem>>, %arg3: memref<8x64xbf16, #tpu.memory_space<vmem>>, %arg4: memref<8x1xf32, #tpu.memory_space<vmem>>, %arg5: memref<1x8x2048xf32, #tpu.memory_space<vmem>>) attributes {dimension_semantics = [#tpu.dimension_semantics<parallel>, #tpu.dimension_semantics<parallel>], iteration_bounds = array<i64: 2, 8>, scalar_prefetch = 0 : i64, scratch_operands = 0 : i64, tpu.core_type = #tpu.core_type<tc>, window_params = [{transform_indices = @transform_0, window_bounds = array<i64: 1, 64, 2048>}, {pipeline_mode = #tpu.pipeline_mode<synchronous>, transform_indices = @transform_1, window_bounds = array<i64: 8, 64>}, {pipeline_mode = #tpu.pipeline_mode<synchronous>, transform_indices = @transform_2, window_bounds = array<i64: 8, 1>}, {transform_indices = @transform_3, window_bounds = array<i64: 1, 8, 2048>}]} {
    %c0 = arith.constant 0 : index
    %c0_0 = arith.constant 0 : index
    %0 = vector.load %arg3[%c0, %c0_0] : memref<8x64xbf16, #tpu.memory_space<vmem>>, vector<8x64xbf16>
    %c0_1 = arith.constant 0 : index
    %c0_2 = arith.constant 0 : index
    %c0_3 = arith.constant 0 : index
    %1 = vector.load %arg2[%c0_1, %c0_2, %c0_3] : memref<1x64x2048xbf16, #tpu.memory_space<vmem>>, vector<1x64x2048xbf16>
    %2 = vector.shape_cast %1 : vector<1x64x2048xbf16> to vector<64x2048xbf16>
    %cst = arith.constant dense<0.000000e+00> : vector<8x2048xf32>
    %3 = tpu.matmul %0, %2, %cst {dimension_numbers = #tpu.dot_dimension_numbers<[1], [0], [0], [1], [0, 0, 1, 1], [], []>} : vector<8x64xbf16>, vector<64x2048xbf16>, vector<8x2048xf32> -> vector<8x2048xf32>
    %c0_4 = arith.constant 0 : index
    %c0_5 = arith.constant 0 : index
    %4 = vector.load %arg4[%c0_4, %c0_5] : memref<8x1xf32, #tpu.memory_space<vmem>>, vector<8x1xf32>
    %5 = vector.broadcast %4 : vector<8x1xf32> to vector<8x2048xf32>
    %6 = arith.addf %3, %5 : vector<8x2048xf32>
    %cst_6 = arith.constant 0.000000e+00 : f32
    %7 = vector.broadcast %cst_6 : f32 to vector<8x2048xf32>
    %8 = arith.cmpf ogt, %6, %7 : vector<8x2048xf32>
    %cst_7 = arith.constant 2.000000e-01 : f32
    %9 = vector.broadcast %cst_7 : f32 to vector<8x2048xf32>
    %10 = arith.mulf %9, %6 : vector<8x2048xf32>
    %11 = arith.select %8, %6, %10 : vector<8x2048xi1>, vector<8x2048xf32>
    %c0_8 = arith.constant 0 : index
    %c0_9 = arith.constant 0 : index
    %c0_10 = arith.constant 0 : index
    %12 = vector.load %arg5[%c0_8, %c0_9, %c0_10] : memref<1x8x2048xf32, #tpu.memory_space<vmem>>, vector<1x8x2048xf32>
    %13 = vector.shape_cast %12 : vector<1x8x2048xf32> to vector<8x2048xf32>
    %14 = vector.shape_cast %11 : vector<8x2048xf32> to vector<1x8x2048xf32>
    tpu.vector_store %arg5[%c0_8, %c0_9, %c0_10], %14 {strides = array<i32>} : memref<1x8x2048xf32, #tpu.memory_space<vmem>>, vector<1x8x2048xf32>,
    return
  }
  func.func @transform_0(%arg0: i32, %arg1: i32) -> (i32, i32, i32) {
    %c0_i32 = arith.constant 0 : i32
    %c0_i32_0 = arith.constant 0 : i32
    return %arg0, %c0_i32, %arg1 : i32, i32, i32
  }
  func.func @transform_1(%arg0: i32, %arg1: i32) -> (i32, i32) {
    %c0_i32 = arith.constant 0 : i32
    %c0_i32_0 = arith.constant 0 : i32
    %c0_i32_1 = arith.constant 0 : i32
    return %c0_i32, %c0_i32_0 : i32, i32
  }
  func.func @transform_2(%arg0: i32, %arg1: i32) -> (i32, i32) {
    %c0_i32 = arith.constant 0 : i32
    %c0_i32_0 = arith.constant 0 : i32
    %c0_i32_1 = arith.constant 0 : i32
    return %c0_i32, %c0_i32_0 : i32, i32
  }
  func.func @transform_3(%arg0: i32, %arg1: i32) -> (i32, i32, i32) {
    %c0_i32 = arith.constant 0 : i32
    %c0_i32_0 = arith.constant 0 : i32
    return %arg0, %c0_i32, %arg1 : i32, i32, i32
  }
}

</mosaic_0001>

<bundles_post_ra>
// kernel: tpu_custom_call.1
= control target key start
LH: loop header
LB: loop body
LE: loop exit
PB: predicated region body
PF: predicated region fallthrough
CT: control target
= control target key end

     0   :  { %s1867_s0 = inlined_call_operand.hbm [shape: bf16[2,64,16384], index: 0, kind: input, shape index: {}]   ;;  %s1868_s1 = inlined_call_operand.hbm [shape: bf16[8,64], index: 1, kind: input, shape index: {}]   ;;  %s1869_s2 = inlined_call_operand.vmem [shape: f32[8,1], index: 2, kind: input, shape index: {}]   ;;  %s1870_s3 = inlined_call_operand.hbm [shape: f32[2,8,16384], index: 3, kind: output, shape index: {}]  }
   0x1   :  { %1881 = sst [smem:[#allocation15_spill]] %s1868_s1 }
   0x2   :  { %8 = vsyncpa [#allocation3], 0 }
   0x3   :  { %10 = vsyncpa [#allocation3 + $0x1], 0 }
   0x4   :  { %11 = vsyncpa [#allocation6], 0 }
   0x5   :  { %12 = vsyncpa [#allocation4], 0 }
   0x6   :  { %14 = vsyncpa [#allocation4 + $0x1], 0  ;;  %s1498_s12 = smov 0   ;;  %s1500_s13 = smov 0  }
   0x7   :  { %s1502_s14 = smov 0   ;;  %s1504_s15 = smov 0  }
   0x8   :  { %s1506_s16 = smov 0   ;;  %s1508_s17 = smov 0  }
   0x9   :  { %s1510_s18 = smov 0   ;;  %s1512_s19 = smov 0  }
   0xa LB: > { %1882 = sst [smem:[#allocation11_spill]] %s1441_s12  ;;  %s1124_s20 = sadd.s32 4294967295, %s1469_s19   ;;  %s1469_s19 = sphi %s1512_s19, %s20_s19   ;;  %s1465_s18 = sphi %s1510_s18, %s1911_s18   ;;  %s1461_s17 = sphi %s1508_s17, %s1910_s17   ;;  %s1457_s16 = sphi %s1506_s16, %s1909_s16   ;;  %s1453_s15 = sphi %s1504_s15, %s1904_s15   ;;  %s1449_s14 = sphi %s1502_s14, %s1908_s14   ;;  %s1445_s13 = sphi %s1500_s13, %s1907_s13   ;;  %s1441_s12 = sphi %s1498_s12, %s1906_s12  }
   0xb   : > { %1883 = sst [smem:[#allocation12_spill]] %s1461_s17  ;;  %s1125_s21 = sadd.s32 4294967294, %s1469_s19  }
   0xc   : > { %p48_p0 = scmp.ne.s32.totalorder %s1449_s14, %s1445_s13  ;;  %p49_p1 = scmp.eq.s32.totalorder %s1469_s19, 0 }
   0xd   : > { %p54_p2 = scmp.ne.s32.totalorder %s1445_s13, %s1441_s12  ;;  %p1546_p3 = scmp.eq.s32.totalorder %s1124_s20, 0 }
   0xe   : > { %p122_p4 = scmp.eq.s32.totalorder %s1124_s20, 15  ;;  %p1550_p5 = por %p49_p1, %p48_p0 }
   0xf   : > { %s1884_s23 = scalar_select %p1546_p3, 1, 0 }
  0x10   : > { %p128_p6 = scmp.eq.s32.totalorder %s1125_s21, 15  ;;  %p1556_p7 = por %p1546_p3, %p54_p2 }
  0x11   : > { %p1560_p8 = por %p122_p4, %p48_p0  ;;  %p1126_p10 = scmp.ge.s32.totalorder %s1469_s19, 1 }
  0x12   : > { %s1886_s25 = scalar_select %p1556_p7, 1, 0 }
  0x13   : > { %s1887_s26 = scalar_select %p1560_p8, 1, 0 }
  0x14   : > { %p1564_p9 = por %p128_p6, %p54_p2  ;;  %p135_p11 = scmp.lt.s32.totalorder %s1469_s19, 17 }
  0x15   : > { %s1471_s29 = smov [#allocation5]   ;;  %p1236_p13 = scmp.lt.s32.totalorder %s1469_s19, 16 }
  0x16   : > { %s1888_s27 = scalar_select %p1564_p9, 1, 0 }
  0x17   : > { %p1570_p12 = pnand %p1126_p10, %p135_p11  ;;  %s148_s30 = sshll.u32 %s1471_s29, 4  ;;  %s149_s30 = int_to_ptr.vmem [resolvable:$true] %s148_s30 }
  0x18   : > { %1889 = sst [smem:[#allocation13_spill]] %s1888_s27  ;;  %p1579_p1 = pnand %p1236_p13, %p1550_p5 }
  0x19   : > { %s1890_s28 = scalar_select %p1570_p12, 1, 0 }
  0x1a   : > { %p1223_p0 = pneg %p1570_p12  ;;  %s29_s6 = sadd.s32 1, %s1461_s17 }
  0x1b   : > { %s1891_s4 = scalar_select %p1579_p1, 1, 0 }
  0x1c   : > { %p1585_p2 = pnand %p1223_p0, %p1546_p3  ;;  %s1893_s1 = sld [smem:[#allocation15_spill]] }
  0x1e   : > { %p1311_p5 = pneg %p1585_p2 }
  0x22   : > { %s1309_s9 = scalar_lea.hbm %s1893_s1, 64 }
  0x23   : > { %p1310_p4 = scmp.ne.s32.totalorder %s1893_s1, %s1309_s9  ;;  %p1316_p11 = scmp.lt.u32.totalorder %s1309_s9, %s1893_s1 }
  0x25   : > { %p1312_p6 = pnand %p1311_p5, %p1310_p4 }
  0x27   : > { %p1313_p10 = pneg %p1312_p6 }
  0x29   : > { %p1318_p13 = pnand %p1316_p11, %p1313_p10 }
  0x2b   : > { %1321 = shalt.err (!%p1318_p13)
}
  0x2c   : > { %s1322_s24 = scalar_lea.vmem %s149_s30, 64  ;;  %p1330_p3 = scmp.lt.s32.totalorder %s149_s30, %s149_s30 }
  0x2d   : > { %p1323_p0 = scmp.ne.s32.totalorder %s149_s30, %s1322_s24  ;;  %p1331_p7 = scmp.lt.s32.totalorder %s1322_s24, %s1322_s24 }
  0x2f   : > { %p1325_p9 = pnand %p1323_p0, %p1311_p5  ;;  %p1332_p12 = por %p1331_p7, %p1330_p3 }
  0x31   : > { %p1326_p8 = pneg %p1325_p9 }
  0x33   : > { %p1333_p1 = pnand %p1332_p12, %p1326_p8 }
  0x35   : > { %1336 = shalt.err (!%p1333_p1)
}
  0x36   : > { %1226 = dma.hbm_to_vmem [thread:$0]  (!%p1585_p2), %s1893_s1, 64, %s149_s30, [#allocation6]  }
  0x37   : > { %p30_p4 = scmp.ge.s32.totalorder %s29_s6, 8  ;;  %s32_s8 = sadd.s32 1, %s1465_s18 }
  0x38   : > { %s162_s9 = sand.u32 1, %s1449_s14   ;;  %s1130_s10 = sshll.u32 %s1461_s17, 4 }
  0x39   : > { %s1913_s6 = smov (%p30_p4, %s29_s6), 0  ;;  %s1915_s8 = smov (!%p30_p4, %s32_s8), %s1465_s18 }
  0x3a   : > { %1894 = sst [smem:[#allocation14_spill]] %s1913_s6  ;;  %s37_s5 = ssub.s32 %s1461_s17, %s1913_s6 }
  0x3b   : > { %p34_p3 = scmp.ge.s32.totalorder %s1915_s8, 2  ;;  %s1129_s11 = sshll.u32 %s162_s9, 9 }
  0x3c   : > { %s1131_s20 = sshll.u32 %s1465_s18, 10  ;;  %s166_s21 = scalar_lea.vmem [#allocation2], %s1129_s11 }
  0x3d   : > { %s1917_s8 = smov (%p34_p3, %s1915_s8), 0  ;;  %s172_s30 = sadd.s32 %s1131_s20, %s1130_s10 }
  0x3e   : > { %s175_s24 = sshll.u32 %s166_s21, 4  ;;  %s36_s29 = ssub.s32 %s1465_s18, %s1917_s8  ;;  %s1624_s24 = int_to_ptr.vmem [resolvable:$true] %s175_s24 }
  0x3f   : > { %s1132_s7 = sshll.u32 %s172_s30, 6  ;;  %s38_s22 = sor.u32 %s37_s5, %s36_s29 }
  0x40   : > { %s1622_s12 = scalar_lea.hbm %s1867_s0, %s1132_s7  ;;  %p39_p7 = scmp.eq.s32.totalorder %s38_s22, 0 }
  0x41   : > { %s1895_s6 = sadd.s32 1, %s1449_s14  ;;  %s1631_s10 = scalar_lea.sflag [#allocation3], %s162_s9 }
  0x42   : > { %s1629_s17 = scalar_select %p39_p7, %s1449_s14, %s1895_s6  }
  0x43   : > { %s1337_s11 = scalar_lea.hbm %s1622_s12, 8192  ;;  %p1896_p9 = scmp.ne.s32.totalorder %s1891_s4, 0 }
  0x44   : > { %p1338_p8 = scmp.ne.s32.totalorder %s1622_s12, %s1337_s11  ;;  %s1342_s5 = scalar_lea.hbm %s1867_s0, 131072 }
  0x45   : > { %p1339_p12 = pneg %p1896_p9  ;;  %p1343_p5 = scmp.lt.u32.totalorder %s1622_s12, %s1867_s0 }
  0x46   : > { %p1344_p6 = scmp.lt.u32.totalorder %s1342_s5, %s1337_s11  ;;  %p1346_p11 = scmp.lt.u32.totalorder %s1337_s11, %s1622_s12 }
  0x47   : > { %p1340_p1 = pnand %p1339_p12, %p1338_p8 }
  0x48   : > { %p1345_p10 = por %p1344_p6, %p1343_p5 }
  0x49   : > { %p1341_p2 = pneg %p1340_p1 }
  0x4a   : > { %p1347_p13 = por %p1346_p11, %p1345_p10 }
  0x4c   : > { %p1348_p0 = pnand %p1347_p13, %p1341_p2 }
  0x4e   : > { %1351 = shalt.err (!%p1348_p0)
}
  0x4f   : > { %s1352_s6 = scalar_lea.vmem %s1624_s24, 8192  ;;  %s1472_s9 = smov [#allocation2]  }
  0x50   : > { %p1353_p4 = scmp.ne.s32.totalorder %s1624_s24, %s1352_s6  ;;  %s1357_s30 = sshll.u32 %s1472_s9, 4  ;;  %s1358_s30 = int_to_ptr.vmem [resolvable:$false] %s1357_s30 }
  0x51   : > { %s1359_s21 = scalar_lea.vmem %s1358_s30, 16384  ;;  %p1360_p8 = scmp.lt.s32.totalorder %s1624_s24, %s1358_s30 }
  0x52   : > { %p1355_p3 = pnand %p1353_p4, %p1339_p12  ;;  %p1361_p1 = scmp.lt.s32.totalorder %s1359_s21, %s1352_s6 }
  0x54   : > { %p1356_p7 = pneg %p1355_p3  ;;  %p1362_p5 = por %p1361_p1, %p1360_p8 }
  0x56   : > { %p1363_p6 = pnand %p1362_p5, %p1356_p7 }
  0x58   : > { %1366 = shalt.err (!%p1363_p6)
}
  0x59   : > { %s1473_s29 = smov 8192   ;;  %s1474_s7 = smov 1024  }
  0x5a   : > { %s1475_s11 = smov 64   ;;  %p1897_p12 = scmp.ne.s32.totalorder %s1890_s28, 0 }
  0x5b   : > { %1230 = dma.hbm_to_vmem [thread:$0]  (!%p1896_p9), %s1622_s12, 8192, %s1624_s24, %s1631_s10, %s1473_s29, %s1474_s7, %s1475_s11  }
  0x5c   : > { %187 = sbr.rel (%p1897_p12) target bundleno = 404 (0x194), region = 32  ;;  %s1662_s1 = sand.u32 (!%p1897_p12), 1, %s1445_s13  }
  0x5d   : > { %s1134_s27 = sshll.u32 (!%p1897_p12), %s1662_s1, 9  ;;  %s190_s5 = scalar_lea.sflag (!%p1897_p12), [#allocation3], %s1662_s1 }
  0x5e   : > { %s1666_s22 = scalar_lea.vmem (!%p1897_p12), [#allocation2], %s1134_s27  ;;  %p1898_p2 = scmp.ne.s32.totalorder (!%p1897_p12), %s1886_s25, 0 }
  0x63   : > { %1428 = dma.done.wait (%p1898_p2), %s190_s5, 8192  }
  0x64   : > { %1430 = vsyncadd (%p1898_p2), %s190_s5, 4294959104  ;;  %p1899_p9 = scmp.ne.s32.totalorder %s1884_s23, 0 }
  0x66   : > { %1432 = dma.done.wait (%p1899_p9), [#allocation6], 64  }
  0x67   : > { %1434 = vsyncadd (%p1899_p9), [#allocation6], 4294967232  ;;  %v1476_v0 = vmov 0   ;;  %v224_v1 = vld [vmem:[%s1666_s22] sm:$0xff]  ;;  %v225_v3 = vld [vmem:[%s1666_s22 + $0x8] sm:$0xff]  ;;  %vm614_vm0 = vcmask 523264  }
  0x68   : > { %650 = vmatprep.mubr.bf16.mxu0 %v1476_v0  ;;  %691 = vmatprep.mubr.bf16.mxu1 %v1476_v0  ;;  %v232_v2 = vld [vmem:[%s1666_s22 + $0x40] sm:$0xff]  ;;  %v233_v5 = vld [vmem:[%s1666_s22 + $0x48] sm:$0xff]  ;;  %v226_v31 = vld [vmem:[%s1666_s22 + $0x10] sm:$0xff]  ;;  %s1136_s25 = sshll.u32 %s1662_s1, 7  ;;  %s1210_s4 = sshll.u32 %s1453_s15, 4 }
  0x69   : > { %1308 = vset.pattern.permute.xlu0 %v1476_v0  ;;  %v1138_v4 = vcombine.high %v224_v1, %v232_v2  ;;  %v1137_v6 = vcombine.low %v224_v1, %v232_v2  ;;  %v240_v7 = vld [vmem:[%s1666_s22 + $0x80] sm:$0xff]  ;;  %v1140_v9 = vcombine.high %v225_v3, %v233_v5  ;;  %v1139_v10 = vcombine.low %v225_v3, %v233_v5  ;;  %v241_v12 = vld [vmem:[%s1666_s22 + $0x88] sm:$0xff]  ;;  %v234_v32 = vld [vmem:[%s1666_s22 + $0x50] sm:$0xff]  ;;  %s1777_s28 = scalar_lea.vmem [#allocation7], %s1136_s25  ;;  %s1211_s24 = sshll.u32 %s1457_s16, 7 }
  0x6a   : > { %v248_v8 = vld [vmem:[%s1666_s22 + $0xc0] sm:$0xff]  ;;  %v249_v13 = vld [vmem:[%s1666_s22 + $0xc8] sm:$0xff]  ;;  %v227_v33 = vld [vmem:[%s1666_s22 + $0x18] sm:$0xff]  ;;  %v1142_v37 = vcombine.high %v226_v31, %v234_v32  ;;  %v1141_v44 = vcombine.low %v226_v31, %v234_v32  ;;  %s1023_s10 = sadd.s32 %s1211_s24, %s1210_s4  ;;  %s1027_s15 = sshll.u32 %s1777_s28, 4  ;;  %s1812_s15 = int_to_ptr.vmem [resolvable:$true] %s1027_s15 }
  0x6b   : > { %v1154_v11 = vcombine.high %v240_v7, %v248_v8  ;;  %v256_v14 = vld [vmem:[%s1666_s22 + $0x100] sm:$0xff]  ;;  %618 = vmatprep.subr.bf16.mxu0 %v1138_v4  ;;  %v1156_v15 = vcombine.high %v241_v12, %v249_v13  ;;  %v257_v17 = vld [vmem:[%s1666_s22 + $0x108] sm:$0xff]  ;;  %659 = vmatprep.subr.bf16.mxu1 %v1140_v9  ;;  %v1153_v19 = vcombine.low %v240_v7, %v248_v8  ;;  %v235_v34 = vld [vmem:[%s1666_s22 + $0x58] sm:$0xff]  ;;  %s1212_s20 = sshll.u32 %s1023_s10, 7  ;;  %s1011_s30 = scalar_lea.sflag [#allocation4], %s1662_s1 }
  0x6c   : > { %v264_v16 = vld [vmem:[%s1666_s22 + $0x140] sm:$0xff]  ;;  %v265_v18 = vld [vmem:[%s1666_s22 + $0x148] sm:$0xff]  ;;  %619 = vmatpush1.bf16.msra.mxu0 %v1137_v6  ;;  %660 = vmatpush1.bf16.msra.mxu1 %v1139_v10  ;;  %v1155_v20 = vcombine.low %v241_v12, %v249_v13  ;;  %v1144_v38 = vcombine.high %v227_v33, %v235_v34  ;;  %v242_v39 = vld [vmem:[%s1666_s22 + $0x90] sm:$0xff]  ;;  %v1143_v45 = vcombine.low %v227_v33, %v235_v34  ;;  %s1810_s9 = scalar_lea.hbm %s1870_s3, %s1212_s20  ;;  %s1367_s21 = scalar_lea.vmem %s1812_s15, 2048 }
  0x6d   : > { %620 = vmatprep.subr.bf16.mxu0 %v1154_v11  ;;  %v1170_v21 = vcombine.high %v256_v14, %v264_v16  ;;  %661 = vmatprep.subr.bf16.mxu1 %v1156_v15  ;;  %v1172_v22 = vcombine.high %v257_v17, %v265_v18  ;;  %v272_v23 = vld [vmem:[%s1666_s22 + $0x180] sm:$0xff]  ;;  %v273_v25 = vld [vmem:[%s1666_s22 + $0x188] sm:$0xff]  ;;  %v1169_v27 = vcombine.low %v256_v14, %v264_v16  ;;  %v250_v40 = vld [vmem:[%s1666_s22 + $0xd0] sm:$0xff]  ;;  %p1368_p10 = scmp.ne.s32.totalorder %s1812_s15, %s1367_s21  ;;  %p1900_p11 = scmp.ne.s32.totalorder %s1887_s26, 0 }
  0x6e   : > { %v280_v24 = vld [vmem:[%s1666_s22 + $0x1c0] sm:$0xff]  ;;  %v281_v26 = vld [vmem:[%s1666_s22 + $0x1c8] sm:$0xff]  ;;  %v1171_v28 = vcombine.low %v257_v17, %v265_v18  ;;  %v243_v41 = vld [vmem:[%s1666_s22 + $0x98] sm:$0xff]  ;;  %v1158_v46 = vcombine.high %v242_v39, %v250_v40  ;;  %v1157_v52 = vcombine.low %v242_v39, %v250_v40  ;;  %s1477_s29 = smov [#allocation7]  }
  0x6f   : > { %v1186_v29 = vcombine.high %v272_v23, %v280_v24  ;;  %v1188_v30 = vcombine.high %v273_v25, %v281_v26  ;;  %v1185_v35 = vcombine.low %v272_v23, %v280_v24  ;;  %v1187_v36 = vcombine.low %v273_v25, %v281_v26  ;;  %v251_v42 = vld [vmem:[%s1666_s22 + $0xd8] sm:$0xff]  ;;  %v1703_v43 = vld [vmem:[#allocation5] sm:$0xf]  ;;  %v258_v48 = vld [vmem:[%s1666_s22 + $0x110] sm:$0xff]  ;;  %p1369_p13 = pnand %p1368_p10, %p1900_p11  ;;  %s1371_s7 = sshll.u32 %s1477_s29, 4  ;;  %s1372_s7 = int_to_ptr.vmem [resolvable:$false] %s1371_s7 }
  0x70   : > { %621 = vmatpush1.bf16.msra.mxu0 %v1153_v19  ;;  %662 = vmatpush1.bf16.msra.mxu1 %v1155_v20  ;;  %v1160_v47 = vcombine.high %v243_v41, %v251_v42  ;;  %v266_v49 = vld [vmem:[%s1666_s22 + $0x150] sm:$0xff]  ;;  %v259_v50 = vld [vmem:[%s1666_s22 + $0x118] sm:$0xff]  ;;  %v1159_v53 = vcombine.low %v243_v41, %v251_v42  ;;  %v288_v55 = vld [vmem:[%s1869_s2] sm:$0xff]  ;;  %s1373_s11 = scalar_lea.vmem %s1372_s7, 4096  ;;  %p1374_p4 = scmp.lt.s32.totalorder %s1812_s15, %s1372_s7 }
  0x71   : > { %622 = vmatprep.subr.bf16.mxu0 %v1170_v21  ;;  %663 = vmatprep.subr.bf16.mxu1 %v1172_v22  ;;  %v267_v51 = vld [vmem:[%s1666_s22 + $0x158] sm:$0xff]  ;;  %v1174_v54 = vcombine.high %v258_v48, %v266_v49  ;;  %v274_v57 = vld [vmem:[%s1666_s22 + $0x190] sm:$0xff]  ;;  %v1173_v61 = vcombine.low %v258_v48, %v266_v49  ;;  %v228_v2 = vld [vmem:[%s1666_s22 + $0x20] sm:$0xff]  ;;  %p1370_p0 = pneg %p1369_p13  ;;  %p1375_p3 = scmp.lt.s32.totalorder %s1373_s11, %s1367_s21 }
  0x72   : > { %v1176_v56 = vcombine.high %v259_v50, %v267_v51  ;;  %v282_v58 = vld [vmem:[%s1666_s22 + $0x1d0] sm:$0xff]  ;;  %v275_v59 = vld [vmem:[%s1666_s22 + $0x198] sm:$0xff]  ;;  %291 = vperm.xlu0 %1308, %v288_v55   ;;  %v1175_v62 = vcombine.low %v259_v50, %v267_v51  ;;  %v236_v3 = vld [vmem:[%s1666_s22 + $0x60] sm:$0xff] }
  0x73   : > { %v283_v60 = vld [vmem:[%s1666_s22 + $0x1d8] sm:$0xff]  ;;  %v1190_v63 = vcombine.high %v274_v57, %v282_v58  ;;  %v229_v4 = vld [vmem:[%s1666_s22 + $0x28] sm:$0xff]  ;;  %v1189_v6 = vcombine.low %v274_v57, %v282_v58  ;;  %v1146_v8 = vcombine.high %v228_v2, %v236_v3  ;;  %v244_v10 = vld [vmem:[%s1666_s22 + $0xa0] sm:$0xff]  ;;  %v1145_v14 = vcombine.low %v228_v2, %v236_v3  ;;  %p1376_p7 = por %p1375_p3, %p1374_p4 }
  0x74   : > { %623 = vmatpush1.bf16.msra.mxu0 %v1169_v27  ;;  %664 = vmatpush1.bf16.msra.mxu1 %v1171_v28  ;;  %v1192_v1 = vcombine.high %v275_v59, %v283_v60  ;;  %v237_v5 = vld [vmem:[%s1666_s22 + $0x68] sm:$0xff]  ;;  %v1191_v7 = vcombine.low %v275_v59, %v283_v60  ;;  %v252_v11 = vld [vmem:[%s1666_s22 + $0xe0] sm:$0xff]  ;;  %v230_v34 = vld [vmem:[%s1666_s22 + $0x30] sm:$0xff] }
  0x75   : > { %624 = vmatprep.subr.bf16.mxu0 %v1186_v29  ;;  %665 = vmatprep.subr.bf16.mxu1 %v1188_v30  ;;  %v1148_v9 = vcombine.high %v229_v4, %v237_v5  ;;  %v245_v12 = vld [vmem:[%s1666_s22 + $0xa8] sm:$0xff]  ;;  %v1147_v15 = vcombine.low %v229_v4, %v237_v5  ;;  %v1162_v16 = vcombine.high %v244_v10, %v252_v11  ;;  %v260_v18 = vld [vmem:[%s1666_s22 + $0x120] sm:$0xff]  ;;  %v246_v42 = vld [vmem:[%s1666_s22 + $0xb0] sm:$0xff]  ;;  %p1377_p8 = pnand %p1376_p7, %p1370_p0 }
  0x76   : > { %v253_v13 = vld [vmem:[%s1666_s22 + $0xe8] sm:$0xff]  ;;  %v268_v19 = vld [vmem:[%s1666_s22 + $0x160] sm:$0xff]  ;;  %v1161_v22 = vcombine.low %v244_v10, %v252_v11  ;;  %v262_v51 = vld [vmem:[%s1666_s22 + $0x130] sm:$0xff] }
  0x77   : > { %v1164_v17 = vcombine.high %v245_v12, %v253_v13  ;;  %v261_v20 = vld [vmem:[%s1666_s22 + $0x128] sm:$0xff]  ;;  %v1163_v23 = vcombine.low %v245_v12, %v253_v13  ;;  %v1178_v24 = vcombine.high %v260_v18, %v268_v19  ;;  %v276_v26 = vld [vmem:[%s1666_s22 + $0x1a0] sm:$0xff]  ;;  %v1177_v30 = vcombine.low %v260_v18, %v268_v19  ;;  %v278_v59 = vld [vmem:[%s1666_s22 + $0x1b0] sm:$0xff] }
  0x78   : > { %625 = vmatpush1.bf16.msra.mxu0 %v1185_v35  ;;  %666 = vmatpush1.bf16.msra.mxu1 %v1187_v36  ;;  %v269_v21 = vld [vmem:[%s1666_s22 + $0x168] sm:$0xff]  ;;  %v284_v27 = vld [vmem:[%s1666_s22 + $0x1e0] sm:$0xff]  ;;  %v238_v35 = vld [vmem:[%s1666_s22 + $0x70] sm:$0xff] }
  0x79   : > { %700 = vmatprep.subr.bf16.mxu0 %v1142_v37  ;;  %741 = vmatprep.subr.bf16.mxu1 %v1144_v38  ;;  %v1180_v25 = vcombine.high %v261_v20, %v269_v21  ;;  %v277_v28 = vld [vmem:[%s1666_s22 + $0x1a8] sm:$0xff]  ;;  %v1179_v31 = vcombine.low %v261_v20, %v269_v21  ;;  %v1194_v32 = vcombine.high %v276_v26, %v284_v27  ;;  %v231_v36 = vld [vmem:[%s1666_s22 + $0x38] sm:$0xff]  ;;  %v286_v60 = vld [vmem:[%s1666_s22 + $0x1f0] sm:$0xff] }
  0x7a   : > { %v285_v29 = vld [vmem:[%s1666_s22 + $0x1e8] sm:$0xff]  ;;  %v239_v37 = vld [vmem:[%s1666_s22 + $0x78] sm:$0xff]  ;;  %v1193_v38 = vcombine.low %v276_v26, %v284_v27  ;;  %v1150_v40 = vcombine.high %v230_v34, %v238_v35  ;;  %v1198_v2 = vcombine.high %v278_v59, %v286_v60  ;;  %v1197_v4 = vcombine.low %v278_v59, %v286_v60 }
  0x7b   : > { %1201 = vmatmul.mubr.msk.bf16.vlgmr.msra.gmra.mrb[0].mxu0 %vm614_vm0, %v1703_v43  ;;  %1202 = vmatmul.mubr.msk.bf16.vlgmr.msra.gmra.mrb[0].mxu1 %vm614_vm0, %v1703_v43  ;;  %v1196_v33 = vcombine.high %v277_v28, %v285_v29  ;;  %v1195_v39 = vcombine.low %v277_v28, %v285_v29  ;;  %v1152_v41 = vcombine.high %v231_v36, %v239_v37 }
  0x7c   : > { %701 = vmatpush1.bf16.msra.mxu0 %v1141_v44  ;;  %742 = vmatpush1.bf16.msra.mxu1 %v1143_v45  ;;  %v254_v44 = vld [vmem:[%s1666_s22 + $0xf0] sm:$0xff]  ;;  %v247_v45 = vld [vmem:[%s1666_s22 + $0xb8] sm:$0xff]  ;;  %v1151_v48 = vcombine.low %v231_v36, %v239_v37 }
  0x7d   : > { %702 = vmatprep.subr.bf16.mxu0 %v1158_v46  ;;  %743 = vmatprep.subr.bf16.mxu1 %v1160_v47  ;;  %v255_v46 = vld [vmem:[%s1666_s22 + $0xf8] sm:$0xff]  ;;  %v1149_v47 = vcombine.low %v230_v34, %v238_v35  ;;  %v1166_v49 = vcombine.high %v246_v42, %v254_v44  ;;  %v1165_v55 = vcombine.low %v246_v42, %v254_v44 }
  0x7e   : > { %732 = vmatprep.mubr.bf16.mxu0 %v1476_v0  ;;  %773 = vmatprep.mubr.bf16.mxu1 %v1476_v0  ;;  %v1168_v50 = vcombine.high %v247_v45, %v255_v46 }
  0x80   : > { %703 = vmatpush1.bf16.msra.mxu0 %v1157_v52  ;;  %744 = vmatpush1.bf16.msra.mxu1 %v1159_v53  ;;  %v270_v52 = vld [vmem:[%s1666_s22 + $0x170] sm:$0xff]  ;;  %v263_v53 = vld [vmem:[%s1666_s22 + $0x138] sm:$0xff] }
  0x81   : > { %704 = vmatprep.subr.bf16.mxu0 %v1174_v54  ;;  %745 = vmatprep.subr.bf16.mxu1 %v1176_v56  ;;  %v271_v54 = vld [vmem:[%s1666_s22 + $0x178] sm:$0xff]  ;;  %v1167_v56 = vcombine.low %v247_v45, %v255_v46  ;;  %v1182_v57 = vcombine.high %v262_v51, %v270_v52 }
  0x82   : > { %v1184_v58 = vcombine.high %v263_v53, %v271_v54 }
  0x84   : > { %705 = vmatpush1.bf16.msra.mxu0 %v1173_v61  ;;  %746 = vmatpush1.bf16.msra.mxu1 %v1175_v62  ;;  %v279_v61 = vld [vmem:[%s1666_s22 + $0x1b8] sm:$0xff] }
  0x85   : > { %706 = vmatprep.subr.bf16.mxu0 %v1190_v63  ;;  %747 = vmatprep.subr.bf16.mxu1 %v1192_v1  ;;  %v287_v62 = vld [vmem:[%s1666_s22 + $0x1f8] sm:$0xff]  ;;  %v1181_v63 = vcombine.low %v262_v51, %v270_v52  ;;  %v1183_v1 = vcombine.low %v263_v53, %v271_v54 }
  0x86   : > { %v1200_v3 = vcombine.high %v279_v61, %v287_v62  ;;  %v1199_v5 = vcombine.low %v279_v61, %v287_v62 }
  0x88   : > { %707 = vmatpush1.bf16.msra.mxu0 %v1189_v6  ;;  %748 = vmatpush1.bf16.msra.mxu1 %v1191_v7 }
  0x89   : > { %782 = vmatprep.subr.bf16.mxu0 %v1146_v8  ;;  %823 = vmatprep.subr.bf16.mxu1 %v1148_v9 }
  0x8b   : > { %1203 = vmatmul.mubr.msk.bf16.vlgmr.msra.gmra.mrb[4].mxu0 %vm614_vm0, %v1703_v43  ;;  %1204 = vmatmul.mubr.msk.bf16.vlgmr.msra.gmra.mrb[4].mxu1 %vm614_vm0, %v1703_v43 }
  0x8c   : > { %783 = vmatpush1.bf16.msra.mxu0 %v1145_v14  ;;  %824 = vmatpush1.bf16.msra.mxu1 %v1147_v15 }
  0x8d   : > { %784 = vmatprep.subr.bf16.mxu0 %v1162_v16  ;;  %825 = vmatprep.subr.bf16.mxu1 %v1164_v17 }
  0x8e   : > { %814 = vmatprep.mubr.bf16.mxu0 %v1476_v0  ;;  %855 = vmatprep.mubr.bf16.mxu1 %v1476_v0 }
  0x90   : > { %785 = vmatpush1.bf16.msra.mxu0 %v1161_v22  ;;  %826 = vmatpush1.bf16.msra.mxu1 %v1163_v23 }
  0x91   : > { %786 = vmatprep.subr.bf16.mxu0 %v1178_v24  ;;  %827 = vmatprep.subr.bf16.mxu1 %v1180_v25 }
  0x94   : > { %787 = vmatpush1.bf16.msra.mxu0 %v1177_v30  ;;  %828 = vmatpush1.bf16.msra.mxu1 %v1179_v31 }
  0x95   : > { %788 = vmatprep.subr.bf16.mxu0 %v1194_v32  ;;  %829 = vmatprep.subr.bf16.mxu1 %v1196_v33 }
  0x98   : > { %789 = vmatpush1.bf16.msra.mxu0 %v1193_v38  ;;  %830 = vmatpush1.bf16.msra.mxu1 %v1195_v39 }
  0x99   : > { %864 = vmatprep.subr.bf16.mxu0 %v1150_v40  ;;  %905 = vmatprep.subr.bf16.mxu1 %v1152_v41 }
  0x9b   : > { %1205 = vmatmul.mubr.msk.bf16.vlgmr.msra.gmra.mrb[8].mxu0 %vm614_vm0, %v1703_v43  ;;  %1206 = vmatmul.mubr.msk.bf16.vlgmr.msra.gmra.mrb[8].mxu1 %vm614_vm0, %v1703_v43 }
  0x9c   : > { %865 = vmatpush1.bf16.msra.mxu0 %v1149_v47  ;;  %906 = vmatpush1.bf16.msra.mxu1 %v1151_v48 }
  0x9d   : > { %866 = vmatprep.subr.bf16.mxu0 %v1166_v49  ;;  %907 = vmatprep.subr.bf16.mxu1 %v1168_v50 }
  0x9e   : > { %896 = vmatprep.mubr.bf16.mxu0 %v1476_v0  ;;  %937 = vmatprep.mubr.bf16.mxu1 %v1476_v0 }
  0xa0   : > { %867 = vmatpush1.bf16.msra.mxu0 %v1165_v55  ;;  %908 = vmatpush1.bf16.msra.mxu1 %v1167_v56 }
  0xa1   : > { %868 = vmatprep.subr.bf16.mxu0 %v1182_v57  ;;  %909 = vmatprep.subr.bf16.mxu1 %v1184_v58 }
  0xa4   : > { %869 = vmatpush1.bf16.msra.mxu0 %v1181_v63  ;;  %910 = vmatpush1.bf16.msra.mxu1 %v1183_v1 }
  0xa5   : > { %870 = vmatprep.subr.bf16.mxu0 %v1198_v2  ;;  %911 = vmatprep.subr.bf16.mxu1 %v1200_v3 }
  0xa8   : > { %871 = vmatpush1.bf16.msra.mxu0 %v1197_v4  ;;  %912 = vmatpush1.bf16.msra.mxu1 %v1199_v5 }
  0xab   : > { %1207 = vmatmul.mubr.msk.bf16.vlgmr.msra.gmra.mrb[12].mxu0 %vm614_vm0, %v1703_v43  ;;  %1208 = vmatmul.mubr.msk.bf16.vlgmr.msra.gmra.mrb[12].mxu1 %vm614_vm0, %v1703_v43 }
  0xf1   : > { %v1770_v0 = vpop.permute.xlu0 %291 }
 0x14e   : > { %v652_v6 = vpop.f32.mrb[0].mxu0  ;;  %v693_v8 = vpop.f32.mrb[0].mxu1 }
 0x14f   : > { %v653_v7 = vadd.f32 %v652_v6, %v1770_v0  ;;  %v654_v9 = vpop.f32.mrb[1].mxu0  ;;  %v694_v10 = vadd.f32 %v693_v8, %v1770_v0  ;;  %v695_v12 = vpop.f32.mrb[1].mxu1 }
 0x150   : > { %v655_v11 = vadd.f32 %v654_v9, %v1770_v0  ;;  %v656_v13 = vpop.f32.mrb[2].mxu0  ;;  %v696_v15 = vadd.f32 %v695_v12, %v1770_v0  ;;  %v697_v16 = vpop.f32.mrb[2].mxu1 }
 0x151   : > { %vm946_vm1 = vcmp.gt.f32.partialorder %v653_v7, 0.0  ;;  %v962_v14 = vmul.f32 0.2, %v653_v7  ;;  %v657_v43 = vpop.f32.mrb[3].mxu0  ;;  %vm948_vm2 = vcmp.gt.f32.partialorder %v694_v10, 0.0  ;;  %v698_v21 = vpop.f32.mrb[3].mxu1 }
 0x152   : > { %v964_v17 = vmul.f32 0.2, %v694_v10  ;;  %vm947_vm3 = vcmp.gt.f32.partialorder %v655_v11, 0.0  ;;  %v963_v18 = vmul.f32 0.2, %v655_v11  ;;  %vm949_vm4 = vcmp.gt.f32.partialorder %v696_v15, 0.0 }
 0x153   : > { %v978_v19 = vsel %vm946_vm1, %v653_v7, %v962_v14  ;;  %v965_v20 = vmul.f32 0.2, %v696_v15 }
 0x154   : > { %994 = vst [vmem:[%s1777_s28] sm:$0xff] %v978_v19  ;;  %v980_v22 = vsel %vm948_vm2, %v694_v10, %v964_v17  ;;  %v979_v23 = vsel %vm947_vm3, %v655_v11, %v963_v18 }
 0x155   : > { %996 = vst [vmem:[%s1777_s28 + $0x10] sm:$0xff] %v980_v22  ;;  %995 = vst [vmem:[%s1777_s28 + $0x8] sm:$0xff] %v979_v23  ;;  %v981_v24 = vsel %vm949_vm4, %v696_v15, %v965_v20 }
 0x156   : > { %997 = vst [vmem:[%s1777_s28 + $0x18] sm:$0xff] %v981_v24 }
 0x15e   : > { %v734_v25 = vpop.f32.mrb[4].mxu0  ;;  %v775_v27 = vpop.f32.mrb[4].mxu1 }
 0x15f   : > { %v735_v26 = vadd.f32 %v734_v25, %v1770_v0  ;;  %v736_v28 = vpop.f32.mrb[5].mxu0  ;;  %v776_v29 = vadd.f32 %v775_v27, %v1770_v0  ;;  %v777_v31 = vpop.f32.mrb[5].mxu1 }
 0x160   : > { %v737_v30 = vadd.f32 %v736_v28, %v1770_v0  ;;  %v738_v32 = vpop.f32.mrb[6].mxu0  ;;  %v778_v34 = vadd.f32 %v777_v31, %v1770_v0  ;;  %v779_v35 = vpop.f32.mrb[6].mxu1 }
 0x161   : > { %vm950_vm5 = vcmp.gt.f32.partialorder %v735_v26, 0.0  ;;  %v966_v33 = vmul.f32 0.2, %v735_v26  ;;  %v739_v36 = vpop.f32.mrb[7].mxu0  ;;  %vm952_vm6 = vcmp.gt.f32.partialorder %v776_v29, 0.0  ;;  %v780_v41 = vpop.f32.mrb[7].mxu1 }
 0x162   : > { %v968_v37 = vmul.f32 0.2, %v776_v29  ;;  %vm951_vm7 = vcmp.gt.f32.partialorder %v737_v30, 0.0  ;;  %v967_v38 = vmul.f32 0.2, %v737_v30  ;;  %vm953_vm8 = vcmp.gt.f32.partialorder %v778_v34, 0.0 }
 0x163   : > { %v982_v39 = vsel %vm950_vm5, %v735_v26, %v966_v33  ;;  %v969_v40 = vmul.f32 0.2, %v778_v34 }
 0x164   : > { %998 = vst [vmem:[%s1777_s28 + $0x20] sm:$0xff] %v982_v39  ;;  %v984_v42 = vsel %vm952_vm6, %v776_v29, %v968_v37  ;;  %v983_v44 = vsel %vm951_vm7, %v737_v30, %v967_v38 }
 0x165   : > { %1000 = vst [vmem:[%s1777_s28 + $0x30] sm:$0xff] %v984_v42  ;;  %999 = vst [vmem:[%s1777_s28 + $0x28] sm:$0xff] %v983_v44  ;;  %v985_v45 = vsel %vm953_vm8, %v778_v34, %v969_v40 }
 0x166   : > { %1001 = vst [vmem:[%s1777_s28 + $0x38] sm:$0xff] %v985_v45 }
 0x16e   : > { %v816_v46 = vpop.f32.mrb[8].mxu0  ;;  %v857_v48 = vpop.f32.mrb[8].mxu1 }
 0x16f   : > { %v817_v47 = vadd.f32 %v816_v46, %v1770_v0  ;;  %v818_v49 = vpop.f32.mrb[9].mxu0  ;;  %v858_v50 = vadd.f32 %v857_v48, %v1770_v0  ;;  %v859_v52 = vpop.f32.mrb[9].mxu1 }
 0x170   : > { %v819_v51 = vadd.f32 %v818_v49, %v1770_v0  ;;  %v820_v53 = vpop.f32.mrb[10].mxu0  ;;  %v860_v55 = vadd.f32 %v859_v52, %v1770_v0  ;;  %v861_v56 = vpop.f32.mrb[10].mxu1 }
 0x171   : > { %vm954_vm9 = vcmp.gt.f32.partialorder %v817_v47, 0.0  ;;  %v970_v54 = vmul.f32 0.2, %v817_v47  ;;  %v821_v57 = vpop.f32.mrb[11].mxu0  ;;  %vm956_vm10 = vcmp.gt.f32.partialorder %v858_v50, 0.0  ;;  %v862_v62 = vpop.f32.mrb[11].mxu1 }
 0x172   : > { %v972_v58 = vmul.f32 0.2, %v858_v50  ;;  %vm955_vm11 = vcmp.gt.f32.partialorder %v819_v51, 0.0  ;;  %v971_v59 = vmul.f32 0.2, %v819_v51  ;;  %vm957_vm12 = vcmp.gt.f32.partialorder %v860_v55, 0.0 }
 0x173   : > { %v986_v60 = vsel %vm954_vm9, %v817_v47, %v970_v54  ;;  %v973_v61 = vmul.f32 0.2, %v860_v55 }
 0x174   : > { %1002 = vst [vmem:[%s1777_s28 + $0x40] sm:$0xff] %v986_v60  ;;  %v988_v63 = vsel %vm956_vm10, %v858_v50, %v972_v58  ;;  %v987_v1 = vsel %vm955_vm11, %v819_v51, %v971_v59 }
 0x175   : > { %1004 = vst [vmem:[%s1777_s28 + $0x50] sm:$0xff] %v988_v63  ;;  %1003 = vst [vmem:[%s1777_s28 + $0x48] sm:$0xff] %v987_v1  ;;  %v989_v2 = vsel %vm957_vm12, %v860_v55, %v973_v61 }
 0x176   : > { %1005 = vst [vmem:[%s1777_s28 + $0x58] sm:$0xff] %v989_v2 }
 0x17e   : > { %v898_v3 = vpop.f32.mrb[12].mxu0  ;;  %v939_v5 = vpop.f32.mrb[12].mxu1 }
 0x17f   : > { %v899_v4 = vadd.f32 %v898_v3, %v1770_v0  ;;  %v900_v6 = vpop.f32.mrb[13].mxu0  ;;  %v940_v7 = vadd.f32 %v939_v5, %v1770_v0  ;;  %v941_v9 = vpop.f32.mrb[13].mxu1 }
 0x180   : > { %v901_v8 = vadd.f32 %v900_v6, %v1770_v0  ;;  %v902_v10 = vpop.f32.mrb[14].mxu0  ;;  %v942_v12 = vadd.f32 %v941_v9, %v1770_v0  ;;  %v943_v13 = vpop.f32.mrb[14].mxu1 }
 0x181   : > { %vm958_vm13 = vcmp.gt.f32.partialorder %v899_v4, 0.0  ;;  %v974_v11 = vmul.f32 0.2, %v899_v4  ;;  %v903_v14 = vpop.f32.mrb[15].mxu0  ;;  %vm960_vm14 = vcmp.gt.f32.partialorder %v940_v7, 0.0  ;;  %v944_v18 = vpop.f32.mrb[15].mxu1 }
 0x182   : > { %v976_v15 = vmul.f32 0.2, %v940_v7  ;;  %vm959_vm15 = vcmp.gt.f32.partialorder %v901_v8, 0.0  ;;  %v975_v16 = vmul.f32 0.2, %v901_v8  ;;  %vm961_vm0 = vcmp.gt.f32.partialorder %v942_v12, 0.0 }
 0x183   : > { %v990_v43 = vsel %vm958_vm13, %v899_v4, %v974_v11  ;;  %v977_v17 = vmul.f32 0.2, %v942_v12 }
 0x184   : > { %1006 = vst [vmem:[%s1777_s28 + $0x60] sm:$0xff] %v990_v43  ;;  %v992_v19 = vsel %vm960_vm14, %v940_v7, %v976_v15  ;;  %v991_v20 = vsel %vm959_vm15, %v901_v8, %v975_v16 }
 0x185   : > { %1008 = vst [vmem:[%s1777_s28 + $0x70] sm:$0xff] %v992_v19  ;;  %1007 = vst [vmem:[%s1777_s28 + $0x68] sm:$0xff] %v991_v20  ;;  %v993_v0 = vsel %vm961_vm0, %v942_v12, %v977_v17 }
 0x186   : > { %1009 = vst [vmem:[%s1777_s28 + $0x78] sm:$0xff] %v993_v0 }
 0x187   : > { %1380 = shalt.err (!%p1377_p8)
}
 0x188   : > { %s1381_s1 = scalar_lea.hbm %s1810_s9, 2048  ;;  %s1385_s22 = scalar_lea.hbm %s1870_s3, 32768 }
 0x189   : > { %p1382_p1 = scmp.ne.s32.totalorder %s1810_s9, %s1381_s1  ;;  %p1386_p12 = scmp.lt.u32.totalorder %s1810_s9, %s1870_s3 }
 0x18a   : > { %p1387_p2 = scmp.lt.u32.totalorder %s1385_s22, %s1381_s1  ;;  %p1389_p10 = scmp.lt.u32.totalorder %s1381_s1, %s1810_s9 }
 0x18b   : > { %p1383_p5 = pnand %p1382_p1, %p1900_p11 }
 0x18c   : > { %p1388_p9 = por %p1387_p2, %p1386_p12 }
 0x18d   : > { %p1384_p6 = pneg %p1383_p5 }
 0x18e   : > { %p1390_p13 = por %p1389_p10, %p1388_p9 }
 0x190   : > { %p1391_p0 = pnand %p1390_p13, %p1384_p6 }
 0x192   : > { %1394 = shalt.err (!%p1391_p0)
}
 0x193   : > { %1221 = dma.vmem_to_hbm [thread:$0]  (%p1900_p11), %s1812_s15, 2048, %s1810_s9, %s1011_s30  }
 0x194 PF: > { %s1901_s25 = sld [smem:[#allocation11_spill]]  ;;  %s1902_s28 = sld [smem:[#allocation13_spill]] }
 0x195   : > { %p1238_p4 = scmp.ge.s32.totalorder %s1469_s19, 2 }
 0x19a   : > { %s1039_s4 = sand.u32 1, %s1901_s25   ;;  %p1903_p3 = scmp.ne.s32.totalorder %s1902_s28, 0 }
 0x19b   : > { %s1040_s24 = scalar_lea.sflag [#allocation4], %s1039_s4 }
 0x19c   : > { %p1232_p7 = pnand %p1238_p4, %p1903_p3 }
 0x19e   : > { %1436 = dma.done.wait (!%p1232_p7), %s1040_s24, 2048  }
 0x19f   : > { %1438 = vsyncadd (!%p1232_p7), %s1040_s24, 4294965248  ;;  %s20_s19 = sadd.s32 1, %s1469_s19   ;;  %s1904_s15 = sld [smem:[#allocation12_spill]] }
 0x1a0   : > { %p17_p8 = scmp.ge.s32.totalorder %s20_s19, 18   ;;  %s1905_s26 = sld [smem:[#allocation14_spill]] }
 0x1a1   : > { %s1906_s12 = smov %s1445_s13  ;;  %s1907_s13 = smov %s1449_s14 }
 0x1a2   : > { %s1908_s14 = smov %s1629_s17  ;;  %s1909_s16 = smov %s1465_s18 }
 0x1a3   : > { %s1911_s18 = smov %s1917_s8  ;;  %19 = sbr.rel (!%p17_p8) target bundleno = 10 (0xa), region = 81 }
 0x1a6   : > { %s1910_s17 = smov %s1905_s26 }
 0x1aa   :  { %1045 = vsyncpa [#allocation3], 1 }
 0x1ab   :  { %1047 = vsyncpa [#allocation3 + $0x1], 1 }
 0x1ac   :  { %1048 = vsyncpa [#allocation6], 1 }
 0x1ad   :  { %1049 = vsyncpa [#allocation4], 1 }
 0x1ae   :  { %1051 = vsyncpa [#allocation4 + $0x1], 1 }

</bundles_post_ra>
